<compile_context>
chip_gen: v7x
topology: tpu7x:2x2x1
jax: 0.10.0
libtpu: 0.0.40
codegen_flags: <defaults>
</compile_context>

<pallas_src>
import math

import jax
import jax.numpy as jnp
from jax.experimental import pallas as pl
from jax.experimental.pallas import tpu as pltpu


# ---------------------------------------------------------------------------
# Kernel 1: fused LayerNorm1 + causal multi-head attention + out_proj + residual
# ---------------------------------------------------------------------------
def _make_attn_block_kernel(num_heads, head_dim, seq_len, emb_dim):
    inv_scale = 1.0 / math.sqrt(head_dim)

    def kernel(x_ref, g1_ref, s1_ref,
               wq_ref, bq_ref, wk_ref, bk_ref, wv_ref, bv_ref,
               wo_ref, bo_ref, o_ref):
        x = x_ref[0]                                             # (T, D) f32

        # LayerNorm (biased variance, eps inside sqrt) -- computed once per row.
        mean = jnp.mean(x, axis=-1, keepdims=True)
        var = jnp.mean((x - mean) ** 2, axis=-1, keepdims=True)
        h = (x - mean) * jax.lax.rsqrt(var + 1e-5)               # rsqrt -> EUP slot
        h = h * g1_ref[...] + s1_ref[...]

        # QKV projections (MXU, f32 accumulate).
        q = jnp.dot(h, wq_ref[...], preferred_element_type=jnp.float32) + bq_ref[...]
        k = jnp.dot(h, wk_ref[...], preferred_element_type=jnp.float32) + bk_ref[...]
        v = jnp.dot(h, wv_ref[...], preferred_element_type=jnp.float32) + bv_ref[...]

        rows = jax.lax.broadcasted_iota(jnp.int32, (seq_len, seq_len), 0)
        cols = jax.lax.broadcasted_iota(jnp.int32, (seq_len, seq_len), 1)
        causal = rows >= cols

        # Per-head attention.  out_proj is folded into the head loop:
        #   concat_h(ctx_h) @ Wo == sum_h ctx_h @ Wo[h*hd:(h+1)*hd, :]
        # so no in-kernel concatenate is needed.
        acc = jnp.zeros((seq_len, emb_dim), jnp.float32)
        for hh in range(num_heads):
            lo = hh * head_dim
            hi = lo + head_dim
            qh = q[:, lo:hi]
            kh = k[:, lo:hi]
            vh = v[:, lo:hi]
            sc = jnp.dot(qh, kh.T, preferred_element_type=jnp.float32) * inv_scale
            sc = jnp.where(causal, sc, -jnp.inf)
            m = jnp.max(sc, axis=-1, keepdims=True)
            p = jnp.exp(sc - m)
            attn = p / jnp.sum(p, axis=-1, keepdims=True)
            # TODO(synk): attention-weight dropout omitted (drop_rate=0.0 / inference).
            ctx_h = jnp.dot(attn, vh, preferred_element_type=jnp.float32)
            acc = acc + jnp.dot(ctx_h, wo_ref[lo:hi, :],
                                preferred_element_type=jnp.float32)

        # out_proj bias + residual shortcut (shortcut dropout is identity at inference).
        o_ref[0] = (x + acc + bo_ref[...]).astype(o_ref.dtype)

    return kernel


def attention_block(x, p, *, num_heads):
    """x: (B, T, D) f32 -> (B, T, D) f32  (LN1 + causal MHA + out_proj + residual)."""
    B, T, D = x.shape
    assert D % num_heads == 0
    head_dim = D // num_heads
    assert T % 8 == 0, "sequence length must be a multiple of 8 (f32 sublane tiling)"

    kernel = _make_attn_block_kernel(num_heads, head_dim, T, D)
    vec = lambda a: a.reshape(1, -1)
    # grid-invariant params (constant index_map); at large sizes give these
    # pipeline_mode=pl.Buffered(1) or pass via scratch to avoid double-buffering.
    bspec = lambda shape: pl.BlockSpec(shape, lambda b: (0, 0))

    cost = pl.CostEstimate(
        flops=B * (8 * T * D * D + 4 * T * T * D),
        transcendentals=B * (num_heads * T * T + T),
        bytes_accessed=4 * (2 * B * T * D + 4 * D * D + 6 * D),
    )

    return pl.pallas_call(
        kernel,
        out_shape=jax.ShapeDtypeStruct((B, T, D), jnp.float32),
        grid_spec=pltpu.PrefetchScalarGridSpec(
            num_scalar_prefetch=0,
            grid=(B,),
            in_specs=[
                pl.BlockSpec((1, T, D), lambda b: (b, 0, 0)),    # x (per-batch slab)
                bspec((1, D)), bspec((1, D)),                    # LN1 scale / shift
                bspec((D, D)), bspec((1, D)),                    # Wq, bq
                bspec((D, D)), bspec((1, D)),                    # Wk, bk
                bspec((D, D)), bspec((1, D)),                    # Wv, bv
                bspec((D, D)), bspec((1, D)),                    # Wo, bo
            ],
            out_specs=pl.BlockSpec((1, T, D), lambda b: (b, 0, 0)),
        ),
        compiler_params=pltpu.CompilerParams(
            dimension_semantics=("parallel",),   # batch axis shards across TCs on v7x
        ),
        cost_estimate=cost,
    )(x, vec(p["ln1_scale"]), vec(p["ln1_shift"]),
      p["wq"], vec(p["bq"]), p["wk"], vec(p["bk"]), p["wv"], vec(p["bv"]),
      p["wo"], vec(p["bo"]))


# ---------------------------------------------------------------------------
# Kernel 2: fused LayerNorm2 + FeedForward (Linear -> GELU(tanh) -> Linear) + residual
# ---------------------------------------------------------------------------
def _make_ffn_block_kernel():
    c = math.sqrt(2.0 / math.pi)

    def kernel(y_ref, g2_ref, s2_ref, w1_ref, b1_ref, w2_ref, b2_ref, o_ref):
        y = y_ref[...]                                           # (tile_m, D)

        mean = jnp.mean(y, axis=-1, keepdims=True)
        var = jnp.mean((y - mean) ** 2, axis=-1, keepdims=True)
        yn = (y - mean) * jax.lax.rsqrt(var + 1e-5)
        yn = yn * g2_ref[...] + s2_ref[...]

        a = jnp.dot(yn, w1_ref[...], preferred_element_type=jnp.float32) + b1_ref[...]
        g = a * 0.5 * (1.0 + jnp.tanh(c * (a + 0.044715 * (a * a * a))))   # GELU(tanh)
        f = jnp.dot(g, w2_ref[...], preferred_element_type=jnp.float32) + b2_ref[...]

        # residual (shortcut dropout identity at inference)
        o_ref[...] = (y + f).astype(o_ref.dtype)

    return kernel


def ffn_block(y, p, *, tile_m=256):
    """y: (B, T, D) f32 -> (B, T, D) f32  (LN2 + FF + residual), row-tiled over B*T."""
    B, T, D = y.shape
    R = B * T
    H4 = p["w1"].shape[1]
    assert R % 8 == 0, "B*T must be a multiple of 8 (f32 sublane tiling)"
    tile_m = min(tile_m, R)
    assert R % tile_m == 0 and tile_m % 8 == 0

    y_flat = y.reshape(R, D)
    vec = lambda a: a.reshape(1, -1)
    cspec = lambda shape: pl.BlockSpec(shape, lambda i: (0, 0))
    kernel = _make_ffn_block_kernel()

    cost = pl.CostEstimate(
        flops=4 * R * D * H4,
        transcendentals=R * H4 + R,
        bytes_accessed=4 * (2 * R * D + 2 * D * H4 + H4 + 3 * D),
    )

    out = pl.pallas_call(
        kernel,
        out_shape=jax.ShapeDtypeStruct((R, D), jnp.float32),
        grid_spec=pltpu.PrefetchScalarGridSpec(
            num_scalar_prefetch=0,
            grid=(R // tile_m,),
            in_specs=[
                pl.BlockSpec((tile_m, D), lambda i: (i, 0)),     # activations (row tile)
                cspec((1, D)), cspec((1, D)),                    # LN2 scale / shift
                cspec((D, H4)), cspec((1, H4)),                  # W1, b1
                cspec((H4, D)), cspec((1, D)),                   # W2, b2
            ],
            out_specs=pl.BlockSpec((tile_m, D), lambda i: (i, 0)),
        ),
        compiler_params=pltpu.CompilerParams(
            dimension_semantics=("parallel",),
        ),
        cost_estimate=cost,
    )(y_flat, vec(p["ln2_scale"]), vec(p["ln2_shift"]),
      p["w1"], vec(p["b1"]), p["w2"], vec(p["b2"]))
    return out.reshape(B, T, D)


def transformer_block_forward(x, params, cfg):
    """Full TransformerBlock forward (dropout treated as identity: drop_rate=0 / inference)."""
    y = attention_block(x.astype(jnp.float32), params, num_heads=cfg["n_heads"])
    return ffn_block(y, params)


# ---------------------------------------------------------------------------
# Parameters (nn.Linear weights stored transposed: (in, out) so x @ W)
# ---------------------------------------------------------------------------
def init_params(key, cfg):
    D = cfg["emb_dim"]
    H4 = 4 * D
    ks = jax.random.split(key, 16)
    n = lambda k, shape, s=0.02: jax.random.normal(k, shape, jnp.float32) * s
    zeros = lambda shape: jnp.zeros(shape, jnp.float32)
    qkv_bias = cfg["qkv_bias"]
    return {
        # LayerNorms (perturbed from ones/zeros so the affine path is exercised)
        "ln1_scale": 1.0 + n(ks[12], (D,), 0.1), "ln1_shift": n(ks[13], (D,), 0.1),
        "ln2_scale": 1.0 + n(ks[14], (D,), 0.1), "ln2_shift": n(ks[15], (D,), 0.1),
        # attention
        "wq": n(ks[0], (D, D)), "bq": n(ks[1], (D,)) if qkv_bias else zeros((D,)),
        "wk": n(ks[2], (D, D)), "bk": n(ks[3], (D,)) if qkv_bias else zeros((D,)),
        "wv": n(ks[4], (D, D)), "bv": n(ks[5], (D,)) if qkv_bias else zeros((D,)),
        "wo": n(ks[6], (D, D)), "bo": n(ks[7], (D,)),
        # feed-forward
        "w1": n(ks[8], (D, H4)), "b1": n(ks[9], (H4,)),
        "w2": n(ks[10], (H4, D)), "b2": n(ks[11], (D,)),
    }


# ---------------------------------------------------------------------------
# Pure-JAX reference (mirrors the PyTorch module)
# ---------------------------------------------------------------------------
def reference_forward(x, p, cfg):
    D = cfg["emb_dim"]
    H = cfg["n_heads"]
    HD = D // H
    B, T, _ = x.shape

    def ln(v, g, s):
        m = v.mean(-1, keepdims=True)
        var = ((v - m) ** 2).mean(-1, keepdims=True)
        return (v - m) / jnp.sqrt(var + 1e-5) * g + s

    h = ln(x, p["ln1_scale"], p["ln1_shift"])
    q = (h @ p["wq"] + p["bq"]).reshape(B, T, H, HD).transpose(0, 2, 1, 3)
    k = (h @ p["wk"] + p["bk"]).reshape(B, T, H, HD).transpose(0, 2, 1, 3)
    v = (h @ p["wv"] + p["bv"]).reshape(B, T, H, HD).transpose(0, 2, 1, 3)
    sc = jnp.einsum("bhqd,bhkd->bhqk", q, k) / math.sqrt(HD)
    mask = jnp.tril(jnp.ones((T, T), bool))
    sc = jnp.where(mask, sc, -jnp.inf)
    attn = jax.nn.softmax(sc, axis=-1)
    ctx = jnp.einsum("bhqk,bhkd->bhqd", attn, v).transpose(0, 2, 1, 3).reshape(B, T, D)
    y = x + (ctx @ p["wo"] + p["bo"])

    yn = ln(y, p["ln2_scale"], p["ln2_shift"])
    a = yn @ p["w1"] + p["b1"]
    g = a * 0.5 * (1.0 + jnp.tanh(math.sqrt(2.0 / math.pi) * (a + 0.044715 * a ** 3)))
    return y + (g @ p["w2"] + p["b2"])


if __name__ == "__main__":
    cfg = {
        "vocab_size": 256,
        "context_length": 16,
        "emb_dim": 32,
        "n_layers": 2,
        "n_heads": 2,
        "drop_rate": 0.0,
        "qkv_bias": False,
    }
    key = jax.random.PRNGKey(0)
    pkey, xkey = jax.random.split(key)
    params = init_params(pkey, cfg)

    B, T, D = 2, 8, cfg["emb_dim"]
    x = jax.random.normal(xkey, (B, T, D), jnp.float32)

    out = transformer_block_forward(x, params, cfg)
    jax.block_until_ready(out)

    ref = reference_forward(x, params, cfg)
    assert out.shape == (B, T, D)
    assert jnp.allclose(out, ref, atol=1e-4, rtol=1e-4), float(jnp.max(jnp.abs(out - ref)))

    print("KERNEL_OK")
</pallas_src>

<mosaic_0001>
module attributes {stable_mosaic.version = 11 : i64} {
  func.func @kernel(%arg0: i32, %arg1: memref<1x8x32xf32, #tpu.memory_space<vmem>>, %arg2: memref<1x32xf32, #tpu.memory_space<vmem>>, %arg3: memref<1x32xf32, #tpu.memory_space<vmem>>, %arg4: memref<32x32xf32, #tpu.memory_space<vmem>>, %arg5: memref<1x32xf32, #tpu.memory_space<vmem>>, %arg6: memref<32x32xf32, #tpu.memory_space<vmem>>, %arg7: memref<1x32xf32, #tpu.memory_space<vmem>>, %arg8: memref<32x32xf32, #tpu.memory_space<vmem>>, %arg9: memref<1x32xf32, #tpu.memory_space<vmem>>, %arg10: memref<32x32xf32, #tpu.memory_space<vmem>>, %arg11: memref<1x32xf32, #tpu.memory_space<vmem>>, %arg12: memref<1x8x32xf32, #tpu.memory_space<vmem>>) attributes {dimension_semantics = [#tpu.dimension_semantics<parallel>], iteration_bounds = array<i64: 2>, scalar_prefetch = 0 : i64, scratch_operands = 0 : i64, tpu.core_type = #tpu.core_type<tc>, window_params = [{transform_indices = @transform_0, window_bounds = array<i64: 1, 8, 32>}, {pipeline_mode = #tpu.pipeline_mode<synchronous>, transform_indices = @transform_1, window_bounds = array<i64: 1, 32>}, {pipeline_mode = #tpu.pipeline_mode<synchronous>, transform_indices = @transform_2, window_bounds = array<i64: 1, 32>}, {pipeline_mode = #tpu.pipeline_mode<synchronous>, transform_indices = @transform_3, window_bounds = array<i64: 32, 32>}, {pipeline_mode = #tpu.pipeline_mode<synchronous>, transform_indices = @transform_4, window_bounds = array<i64: 1, 32>}, {pipeline_mode = #tpu.pipeline_mode<synchronous>, transform_indices = @transform_5, window_bounds = array<i64: 32, 32>}, {pipeline_mode = #tpu.pipeline_mode<synchronous>, transform_indices = @transform_6, window_bounds = array<i64: 1, 32>}, {pipeline_mode = #tpu.pipeline_mode<synchronous>, transform_indices = @transform_7, window_bounds = array<i64: 32, 32>}, {pipeline_mode = #tpu.pipeline_mode<synchronous>, transform_indices = @transform_8, window_bounds = array<i64: 1, 32>}, {pipeline_mode = #tpu.pipeline_mode<synchronous>, transform_indices = @transform_9, window_bounds = array<i64: 32, 32>}, {pipeline_mode = #tpu.pipeline_mode<synchronous>, transform_indices = @transform_10, window_bounds = array<i64: 1, 32>}, {transform_indices = @transform_11, window_bounds = array<i64: 1, 8, 32>}]} {
    %c0 = arith.constant 0 : index
    %c0_0 = arith.constant 0 : index
    %c0_1 = arith.constant 0 : index
    %0 = vector.load %arg1[%c0, %c0_0, %c0_1] : memref<1x8x32xf32, #tpu.memory_space<vmem>>, vector<1x8x32xf32>
    %1 = vector.shape_cast %0 : vector<1x8x32xf32> to vector<8x32xf32>
    %cst = arith.constant dense<0.000000e+00> : vector<8xf32>
    %2 = vector.multi_reduction <add>, %1, %cst [1] : vector<8x32xf32> to vector<8xf32>
    %3 = vector.shape_cast %2 : vector<8xf32> to vector<8x1xf32>
    %cst_2 = arith.constant 3.200000e+01 : f32
    %4 = vector.broadcast %cst_2 : f32 to vector<8x1xf32>
    %5 = arith.divf %3, %4 : vector<8x1xf32>
    %6 = vector.broadcast %5 : vector<8x1xf32> to vector<8x32xf32>
    %7 = arith.subf %1, %6 : vector<8x32xf32>
    %8 = arith.mulf %7, %7 : vector<8x32xf32>
    %cst_3 = arith.constant dense<0.000000e+00> : vector<8xf32>
    %9 = vector.multi_reduction <add>, %8, %cst_3 [1] : vector<8x32xf32> to vector<8xf32>
    %10 = vector.shape_cast %9 : vector<8xf32> to vector<8x1xf32>
    %cst_4 = arith.constant 3.200000e+01 : f32
    %11 = vector.broadcast %cst_4 : f32 to vector<8x1xf32>
    %12 = arith.divf %10, %11 : vector<8x1xf32>
    %13 = vector.broadcast %5 : vector<8x1xf32> to vector<8x32xf32>
    %14 = arith.subf %1, %13 : vector<8x32xf32>
    %cst_5 = arith.constant 9.99999974E-6 : f32
    %15 = vector.broadcast %cst_5 : f32 to vector<8x1xf32>
    %16 = arith.addf %12, %15 : vector<8x1xf32>
    %17 = math.rsqrt %16 : vector<8x1xf32>
    %18 = vector.broadcast %17 : vector<8x1xf32> to vector<8x32xf32>
    %19 = arith.mulf %14, %18 : vector<8x32xf32>
    %c0_6 = arith.constant 0 : index
    %c0_7 = arith.constant 0 : index
    %20 = vector.load %arg2[%c0_6, %c0_7] : memref<1x32xf32, #tpu.memory_space<vmem>>, vector<1x32xf32>
    %21 = vector.broadcast %20 : vector<1x32xf32> to vector<8x32xf32>
    %22 = arith.mulf %19, %21 : vector<8x32xf32>
    %c0_8 = arith.constant 0 : index
    %c0_9 = arith.constant 0 : index
    %23 = vector.load %arg3[%c0_8, %c0_9] : memref<1x32xf32, #tpu.memory_space<vmem>>, vector<1x32xf32>
    %24 = vector.broadcast %23 : vector<1x32xf32> to vector<8x32xf32>
    %25 = arith.addf %22, %24 : vector<8x32xf32>
    %c0_10 = arith.constant 0 : index
    %c0_11 = arith.constant 0 : index
    %26 = vector.load %arg4[%c0_10, %c0_11] : memref<32x32xf32, #tpu.memory_space<vmem>>, vector<32x32xf32>
    %cst_12 = arith.constant dense<0.000000e+00> : vector<8x32xf32>
    %27 = tpu.matmul %25, %26, %cst_12 {dimension_numbers = #tpu.dot_dimension_numbers<[1], [0], [0], [1], [0, 0, 1, 1], [], []>} : vector<8x32xf32>, vector<32x32xf32>, vector<8x32xf32> -> vector<8x32xf32>
    %c0_13 = arith.constant 0 : index
    %c0_14 = arith.constant 0 : index
    %28 = vector.load %arg5[%c0_13, %c0_14] : memref<1x32xf32, #tpu.memory_space<vmem>>, vector<1x32xf32>
    %29 = vector.broadcast %28 : vector<1x32xf32> to vector<8x32xf32>
    %30 = arith.addf %27, %29 : vector<8x32xf32>
    %c0_15 = arith.constant 0 : index
    %c0_16 = arith.constant 0 : index
    %31 = vector.load %arg6[%c0_15, %c0_16] : memref<32x32xf32, #tpu.memory_space<vmem>>, vector<32x32xf32>
    %cst_17 = arith.constant dense<0.000000e+00> : vector<8x32xf32>
    %32 = tpu.matmul %25, %31, %cst_17 {dimension_numbers = #tpu.dot_dimension_numbers<[1], [0], [0], [1], [0, 0, 1, 1], [], []>} : vector<8x32xf32>, vector<32x32xf32>, vector<8x32xf32> -> vector<8x32xf32>
    %c0_18 = arith.constant 0 : index
    %c0_19 = arith.constant 0 : index
    %33 = vector.load %arg7[%c0_18, %c0_19] : memref<1x32xf32, #tpu.memory_space<vmem>>, vector<1x32xf32>
    %34 = vector.broadcast %33 : vector<1x32xf32> to vector<8x32xf32>
    %35 = arith.addf %32, %34 : vector<8x32xf32>
    %c0_20 = arith.constant 0 : index
    %c0_21 = arith.constant 0 : index
    %36 = vector.load %arg8[%c0_20, %c0_21] : memref<32x32xf32, #tpu.memory_space<vmem>>, vector<32x32xf32>
    %cst_22 = arith.constant dense<0.000000e+00> : vector<8x32xf32>
    %37 = tpu.matmul %25, %36, %cst_22 {dimension_numbers = #tpu.dot_dimension_numbers<[1], [0], [0], [1], [0, 0, 1, 1], [], []>} : vector<8x32xf32>, vector<32x32xf32>, vector<8x32xf32> -> vector<8x32xf32>
    %c0_23 = arith.constant 0 : index
    %c0_24 = arith.constant 0 : index
    %38 = vector.load %arg9[%c0_23, %c0_24] : memref<1x32xf32, #tpu.memory_space<vmem>>, vector<1x32xf32>
    %39 = vector.broadcast %38 : vector<1x32xf32> to vector<8x32xf32>
    %40 = arith.addf %37, %39 : vector<8x32xf32>
    %41 = tpu.iota {dimensions = array<i32: 0>} : vector<8x8xi32>
    %42 = tpu.iota {dimensions = array<i32: 1>} : vector<8x8xi32>
    %43 = arith.cmpi sge, %41, %42 : vector<8x8xi32>
    %cst_25 = arith.constant 0.000000e+00 : f32
    %44 = vector.broadcast %cst_25 : f32 to vector<8x32xf32>
    %45 = vector.extract_strided_slice %30 {offsets = [0, 0], sizes = [8, 16], strides = [1, 1]} : vector<8x32xf32> to vector<8x16xf32>
    %46 = vector.extract_strided_slice %35 {offsets = [0, 0], sizes = [8, 16], strides = [1, 1]} : vector<8x32xf32> to vector<8x16xf32>
    %47 = vector.extract_strided_slice %40 {offsets = [0, 0], sizes = [8, 16], strides = [1, 1]} : vector<8x32xf32> to vector<8x16xf32>
    %48 = tpu.transpose %46, [1, 0] : vector<8x16xf32> -> vector<16x8xf32>
    %cst_26 = arith.constant dense<0.000000e+00> : vector<8x8xf32>
    %49 = tpu.matmul %45, %48, %cst_26 {dimension_numbers = #tpu.dot_dimension_numbers<[1], [0], [0], [1], [0, 0, 1, 1], [], []>} : vector<8x16xf32>, vector<16x8xf32>, vector<8x8xf32> -> vector<8x8xf32>
    %cst_27 = arith.constant 2.500000e-01 : f32
    %50 = vector.broadcast %cst_27 : f32 to vector<8x8xf32>
    %51 = arith.mulf %49, %50 : vector<8x8xf32>
    %cst_28 = arith.constant 0xFF800000 : f32
    %52 = vector.broadcast %cst_28 : f32 to vector<8x8xf32>
    %53 = arith.select %43, %51, %52 : vector<8x8xi1>, vector<8x8xf32>
    %cst_29 = arith.constant dense<0xFF800000> : vector<8xf32>
    %54 = vector.multi_reduction <maximumf>, %53, %cst_29 [1] : vector<8x8xf32> to vector<8xf32>
    %55 = vector.shape_cast %54 : vector<8xf32> to vector<8x1xf32>
    %56 = vector.broadcast %55 : vector<8x1xf32> to vector<8x8xf32>
    %57 = arith.subf %53, %56 : vector<8x8xf32>
    %58 = math.exp %57 : vector<8x8xf32>
    %cst_30 = arith.constant dense<0.000000e+00> : vector<8xf32>
    %59 = vector.multi_reduction <add>, %58, %cst_30 [1] : vector<8x8xf32> to vector<8xf32>
    %60 = vector.shape_cast %59 : vector<8xf32> to vector<8x1xf32>
    %61 = vector.broadcast %60 : vector<8x1xf32> to vector<8x8xf32>
    %62 = arith.divf %58, %61 : vector<8x8xf32>
    %cst_31 = arith.constant dense<0.000000e+00> : vector<8x16xf32>
    %63 = tpu.matmul %62, %47, %cst_31 {dimension_numbers = #tpu.dot_dimension_numbers<[1], [0], [0], [1], [0, 0, 1, 1], [], []>} : vector<8x8xf32>, vector<8x16xf32>, vector<8x16xf32> -> vector<8x16xf32>
    %c0_32 = arith.constant 0 : index
    %c0_33 = arith.constant 0 : index
    %64 = vector.load %arg10[%c0_32, %c0_33] : memref<32x32xf32, #tpu.memory_space<vmem>>, vector<16x32xf32>
    %cst_34 = arith.constant dense<0.000000e+00> : vector<8x32xf32>
    %65 = tpu.matmul %63, %64, %cst_34 {dimension_numbers = #tpu.dot_dimension_numbers<[1], [0], [0], [1], [0, 0, 1, 1], [], []>} : vector<8x16xf32>, vector<16x32xf32>, vector<8x32xf32> -> vector<8x32xf32>
    %66 = arith.addf %44, %65 : vector<8x32xf32>
    %67 = vector.extract_strided_slice %30 {offsets = [0, 16], sizes = [8, 16], strides = [1, 1]} : vector<8x32xf32> to vector<8x16xf32>
    %68 = vector.extract_strided_slice %35 {offsets = [0, 16], sizes = [8, 16], strides = [1, 1]} : vector<8x32xf32> to vector<8x16xf32>
    %69 = vector.extract_strided_slice %40 {offsets = [0, 16], sizes = [8, 16], strides = [1, 1]} : vector<8x32xf32> to vector<8x16xf32>
    %70 = tpu.transpose %68, [1, 0] : vector<8x16xf32> -> vector<16x8xf32>
    %cst_35 = arith.constant dense<0.000000e+00> : vector<8x8xf32>
    %71 = tpu.matmul %67, %70, %cst_35 {dimension_numbers = #tpu.dot_dimension_numbers<[1], [0], [0], [1], [0, 0, 1, 1], [], []>} : vector<8x16xf32>, vector<16x8xf32>, vector<8x8xf32> -> vector<8x8xf32>
    %cst_36 = arith.constant 2.500000e-01 : f32
    %72 = vector.broadcast %cst_36 : f32 to vector<8x8xf32>
    %73 = arith.mulf %71, %72 : vector<8x8xf32>
    %cst_37 = arith.constant 0xFF800000 : f32
    %74 = vector.broadcast %cst_37 : f32 to vector<8x8xf32>
    %75 = arith.select %43, %73, %74 : vector<8x8xi1>, vector<8x8xf32>
    %cst_38 = arith.constant dense<0xFF800000> : vector<8xf32>
    %76 = vector.multi_reduction <maximumf>, %75, %cst_38 [1] : vector<8x8xf32> to vector<8xf32>
    %77 = vector.shape_cast %76 : vector<8xf32> to vector<8x1xf32>
    %78 = vector.broadcast %77 : vector<8x1xf32> to vector<8x8xf32>
    %79 = arith.subf %75, %78 : vector<8x8xf32>
    %80 = math.exp %79 : vector<8x8xf32>
    %cst_39 = arith.constant dense<0.000000e+00> : vector<8xf32>
    %81 = vector.multi_reduction <add>, %80, %cst_39 [1] : vector<8x8xf32> to vector<8xf32>
    %82 = vector.shape_cast %81 : vector<8xf32> to vector<8x1xf32>
    %83 = vector.broadcast %82 : vector<8x1xf32> to vector<8x8xf32>
    %84 = arith.divf %80, %83 : vector<8x8xf32>
    %cst_40 = arith.constant dense<0.000000e+00> : vector<8x16xf32>
    %85 = tpu.matmul %84, %69, %cst_40 {dimension_numbers = #tpu.dot_dimension_numbers<[1], [0], [0], [1], [0, 0, 1, 1], [], []>} : vector<8x8xf32>, vector<8x16xf32>, vector<8x16xf32> -> vector<8x16xf32>
    %c16 = arith.constant 16 : index
    %c0_41 = arith.constant 0 : index
    %86 = vector.load %arg10[%c16, %c0_41] : memref<32x32xf32, #tpu.memory_space<vmem>>, vector<16x32xf32>
    %cst_42 = arith.constant dense<0.000000e+00> : vector<8x32xf32>
    %87 = tpu.matmul %85, %86, %cst_42 {dimension_numbers = #tpu.dot_dimension_numbers<[1], [0], [0], [1], [0, 0, 1, 1], [], []>} : vector<8x16xf32>, vector<16x32xf32>, vector<8x32xf32> -> vector<8x32xf32>
    %88 = arith.addf %66, %87 : vector<8x32xf32>
    %89 = arith.addf %1, %88 : vector<8x32xf32>
    %c0_43 = arith.constant 0 : index
    %c0_44 = arith.constant 0 : index
    %90 = vector.load %arg11[%c0_43, %c0_44] : memref<1x32xf32, #tpu.memory_space<vmem>>, vector<1x32xf32>
    %91 = vector.broadcast %90 : vector<1x32xf32> to vector<8x32xf32>
    %92 = arith.addf %89, %91 : vector<8x32xf32>
    %c0_45 = arith.constant 0 : index
    %c0_46 = arith.constant 0 : index
    %c0_47 = arith.constant 0 : index
    %93 = vector.load %arg12[%c0_45, %c0_46, %c0_47] : memref<1x8x32xf32, #tpu.memory_space<vmem>>, vector<1x8x32xf32>
    %94 = vector.shape_cast %93 : vector<1x8x32xf32> to vector<8x32xf32>
    %95 = vector.shape_cast %92 : vector<8x32xf32> to vector<1x8x32xf32>
    tpu.vector_store %arg12[%c0_45, %c0_46, %c0_47], %95 {strides = array<i32>} : memref<1x8x32xf32, #tpu.memory_space<vmem>>, vector<1x8x32xf32>,
    return
  }
  func.func @transform_0(%arg0: i32) -> (i32, i32, i32) {
    %c0_i32 = arith.constant 0 : i32
    %c0_i32_0 = arith.constant 0 : i32
    %c0_i32_1 = arith.constant 0 : i32
    return %arg0, %c0_i32, %c0_i32_0 : i32, i32, i32
  }
  func.func @transform_1(%arg0: i32) -> (i32, i32) {
    %c0_i32 = arith.constant 0 : i32
    %c0_i32_0 = arith.constant 0 : i32
    %c0_i32_1 = arith.constant 0 : i32
    return %c0_i32, %c0_i32_0 : i32, i32
  }
  func.func @transform_2(%arg0: i32) -> (i32, i32) {
    %c0_i32 = arith.constant 0 : i32
    %c0_i32_0 = arith.constant 0 : i32
    %c0_i32_1 = arith.constant 0 : i32
    return %c0_i32, %c0_i32_0 : i32, i32
  }
  func.func @transform_3(%arg0: i32) -> (i32, i32) {
    %c0_i32 = arith.constant 0 : i32
    %c0_i32_0 = arith.constant 0 : i32
    %c0_i32_1 = arith.constant 0 : i32
    return %c0_i32, %c0_i32_0 : i32, i32
  }
  func.func @transform_4(%arg0: i32) -> (i32, i32) {
    %c0_i32 = arith.constant 0 : i32
    %c0_i32_0 = arith.constant 0 : i32
    %c0_i32_1 = arith.constant 0 : i32
    return %c0_i32, %c0_i32_0 : i32, i32
  }
  func.func @transform_5(%arg0: i32) -> (i32, i32) {
    %c0_i32 = arith.constant 0 : i32
    %c0_i32_0 = arith.constant 0 : i32
    %c0_i32_1 = arith.constant 0 : i32
    return %c0_i32, %c0_i32_0 : i32, i32
  }
  func.func @transform_6(%arg0: i32) -> (i32, i32) {
    %c0_i32 = arith.constant 0 : i32
    %c0_i32_0 = arith.constant 0 : i32
    %c0_i32_1 = arith.constant 0 : i32
    return %c0_i32, %c0_i32_0 : i32, i32
  }
  func.func @transform_7(%arg0: i32) -> (i32, i32) {
    %c0_i32 = arith.constant 0 : i32
    %c0_i32_0 = arith.constant 0 : i32
    %c0_i32_1 = arith.constant 0 : i32
    return %c0_i32, %c0_i32_0 : i32, i32
  }
  func.func @transform_8(%arg0: i32) -> (i32, i32) {
    %c0_i32 = arith.constant 0 : i32
    %c0_i32_0 = arith.constant 0 : i32
    %c0_i32_1 = arith.constant 0 : i32
    return %c0_i32, %c0_i32_0 : i32, i32
  }
  func.func @transform_9(%arg0: i32) -> (i32, i32) {
    %c0_i32 = arith.constant 0 : i32
    %c0_i32_0 = arith.constant 0 : i32
    %c0_i32_1 = arith.constant 0 : i32
    return %c0_i32, %c0_i32_0 : i32, i32
  }
  func.func @transform_10(%arg0: i32) -> (i32, i32) {
    %c0_i32 = arith.constant 0 : i32
    %c0_i32_0 = arith.constant 0 : i32
    %c0_i32_1 = arith.constant 0 : i32
    return %c0_i32, %c0_i32_0 : i32, i32
  }
  func.func @transform_11(%arg0: i32) -> (i32, i32, i32) {
    %c0_i32 = arith.constant 0 : i32
    %c0_i32_0 = arith.constant 0 : i32
    %c0_i32_1 = arith.constant 0 : i32
    return %arg0, %c0_i32, %c0_i32_0 : i32, i32, i32
  }
}

</mosaic_0001>

<bundles_post_ra>
// kernel: tpu_custom_call.1
= control target key start
LH: loop header
LB: loop body
LE: loop exit
PB: predicated region body
PF: predicated region fallthrough
CT: control target
= control target key end

     0   :  { %s2445_s0 = inlined_call_operand.hbm [shape: f32[2,8,32], index: 0, kind: input, shape index: {}]   ;;  %s2446_s1 = inlined_call_operand.vmem [shape: f32[1,32], index: 1, kind: input, shape index: {}]   ;;  %s2447_s2 = inlined_call_operand.vmem [shape: f32[1,32], index: 2, kind: input, shape index: {}]   ;;  %s2448_s3 = inlined_call_operand.hbm [shape: f32[32,32], index: 3, kind: input, shape index: {}]   ;;  %s2449_s4 = inlined_call_operand.hbm [shape: f32[1,32], index: 4, kind: input, shape index: {}]   ;;  %s2450_s5 = inlined_call_operand.hbm [shape: f32[32,32], index: 5, kind: input, shape index: {}]   ;;  %s2451_s6 = inlined_call_operand.hbm [shape: f32[1,32], index: 6, kind: input, shape index: {}]   ;;  %s2452_s7 = inlined_call_operand.hbm [shape: f32[32,32], index: 7, kind: input, shape index: {}]   ;;  %s2453_s8 = inlined_call_operand.hbm [shape: f32[1,32], index: 8, kind: input, shape index: {}]   ;;  %s2454_s9 = inlined_call_operand.vmem [shape: f32[32,32], index: 9, kind: input, shape index: {}]   ;;  %s2455_s10 = inlined_call_operand.vmem [shape: f32[1,32], index: 10, kind: input, shape index: {}]   ;;  %s2456_s11 = inlined_call_operand.hbm [shape: f32[2,8,32], index: 11, kind: output, shape index: {}]  }
   0x1   :  { %2462 = sst [smem:[#allocation20_spill]] %s2448_s3 }
   0x2   :  { %2463 = sst [smem:[#allocation21_spill]] %s2454_s9 }
   0x3   :  { %2464 = sst [smem:[#allocation22_spill]] %s2455_s10 }
   0x4   :  { %2465 = sst [smem:[#allocation23_spill]] %s2456_s11 }
   0x5   :  { %16 = vsyncpa [#allocation3], 0 }
   0x6   :  { %18 = vsyncpa [#allocation3 + $0x1], 0 }
   0x7   :  { %19 = vsyncpa [#allocation6], 0 }
   0x8   :  { %20 = vsyncpa [#allocation9], 0 }
   0x9   :  { %21 = vsyncpa [#allocation12], 0 }
   0xa   :  { %22 = vsyncpa [#allocation4], 0 }
   0xb   :  { %24 = vsyncpa [#allocation4 + $0x1], 0  ;;  %s2035_s17 = smov 0   ;;  %s2037_s18 = smov 0  }
   0xc   :  { %s2039_s19 = smov 0   ;;  %s2041_s20 = smov 0  }
   0xd LB: > { %s1961_s21 = smov [#allocation5]   ;;  %s2056_s23 = sadd.s32 4294967295, %s1959_s20   ;;  %s1959_s20 = sphi %s2041_s20, %s2492_s20   ;;  %s1955_s19 = sphi %s2039_s19, %s2491_s19   ;;  %s1951_s18 = sphi %s2037_s18, %s2490_s18   ;;  %s1947_s17 = sphi %s2035_s17, %s2489_s17  }
   0xe   : > { %s315_s22 = sshll.u32 %s1961_s21, 4  ;;  %p1400_p0 = scmp.ge.s32.totalorder %s1959_s20, 1  ;;  %s2061_s22 = int_to_ptr.vmem [resolvable:$true] %s315_s22 }
   0xf   : > { %p2459_p1 = scmp.eq.s32.totalorder %s2056_s23, 0  ;;  %p297_p2 = scmp.lt.s32.totalorder %s1959_s20, 3 }
  0x10   : > { %s1962_s25 = smov [#allocation8]   ;;  %s1963_s28 = smov [#allocation11]  }
  0x11   : > { %p2063_p3 = pnand %p1400_p0, %p297_p2  ;;  %s339_s26 = sshll.u32 %s1962_s25, 4  ;;  %s2076_s26 = int_to_ptr.vmem [resolvable:$true] %s339_s26 }
  0x12   : > { %s363_s29 = sshll.u32 %s1963_s28, 4  ;;  %s2468_s3 = sld [smem:[#allocation20_spill]]  ;;  %s2078_s29 = int_to_ptr.vmem [resolvable:$true] %s363_s29 }
  0x13   : > { %s2466_s24 = scalar_select %p2063_p3, 1, 0 }
  0x14   : > { %p1588_p5 = pneg %p2063_p3 }
  0x16   : > { %p2072_p6 = pnand %p1588_p5, %p2459_p1 }
  0x18   : > { %s1683_s13 = scalar_lea.hbm %s2468_s3, 512  ;;  %p2088_p8 = pneg %p2072_p6 }
  0x19   : > { %p1684_p7 = scmp.ne.s32.totalorder %s2468_s3, %s1683_s13  ;;  %p1690_p11 = scmp.lt.u32.totalorder %s1683_s13, %s2468_s3 }
  0x1b   : > { %p1686_p9 = pnand %p2088_p8, %p1684_p7 }
  0x1d   : > { %p1687_p10 = pneg %p1686_p9 }
  0x1f   : > { %p1692_p12 = pnand %p1690_p11, %p1687_p10 }
  0x21   : > { %1695 = shalt.err (!%p1692_p12)
}
  0x22   : > { %s1696_s28 = scalar_lea.vmem %s2061_s22, 512  ;;  %p1704_p5 = scmp.lt.s32.totalorder %s2061_s22, %s2061_s22 }
  0x23   : > { %p1697_p13 = scmp.ne.s32.totalorder %s2061_s22, %s1696_s28  ;;  %p1705_p4 = scmp.lt.s32.totalorder %s1696_s28, %s1696_s28 }
  0x25   : > { %p1699_p0 = pnand %p1697_p13, %p2088_p8  ;;  %p1706_p7 = por %p1705_p4, %p1704_p5 }
  0x27   : > { %p1700_p2 = pneg %p1699_p0 }
  0x29   : > { %p1707_p9 = pnand %p1706_p7, %p1700_p2 }
  0x2b   : > { %1710 = shalt.err (!%p1707_p9)
}
  0x2c   : > { %s1964_s30 = smov 128   ;;  %s1965_s12 = smov 8  }
  0x2d   : > { %1591 = dma.hbm_to_vmem [thread:$0]  (!%p2072_p6), %s2468_s3, 512, %s2061_s22, [#allocation6], %s1964_s30, %s1964_s30, %s1965_s12  }
  0x2e   : > { %s1711_s25 = scalar_lea.hbm %s2450_s5, 512 }
  0x2f   : > { %p1712_p4 = scmp.ne.s32.totalorder %s2450_s5, %s1711_s25  ;;  %p1718_p12 = scmp.lt.u32.totalorder %s1711_s25, %s2450_s5 }
  0x31   : > { %p1714_p10 = pnand %p1712_p4, %p2088_p8 }
  0x33   : > { %p1715_p11 = pneg %p1714_p10 }
  0x35   : > { %p1720_p13 = pnand %p1718_p12, %p1715_p11 }
  0x37   : > { %1723 = shalt.err (!%p1720_p13)
}
  0x38   : > { %s1724_s22 = scalar_lea.vmem %s2076_s26, 512  ;;  %p1732_p7 = scmp.lt.s32.totalorder %s2076_s26, %s2076_s26 }
  0x39   : > { %p1725_p0 = scmp.ne.s32.totalorder %s2076_s26, %s1724_s22  ;;  %p1733_p9 = scmp.lt.s32.totalorder %s1724_s22, %s1724_s22 }
  0x3b   : > { %p1727_p2 = pnand %p1725_p0, %p2088_p8  ;;  %p1734_p4 = por %p1733_p9, %p1732_p7 }
  0x3d   : > { %p1728_p5 = pneg %p1727_p2 }
  0x3f   : > { %p1735_p10 = pnand %p1734_p4, %p1728_p5 }
  0x41   : > { %1738 = shalt.err (!%p1735_p10)
}
  0x42   : > { %1597 = dma.hbm_to_vmem [thread:$0]  (!%p2072_p6), %s2450_s5, 512, %s2076_s26, [#allocation9], %s1964_s30, %s1964_s30, %s1965_s12  }
  0x43   : > { %s1739_s14 = scalar_lea.hbm %s2452_s7, 512 }
  0x44   : > { %p1740_p11 = scmp.ne.s32.totalorder %s2452_s7, %s1739_s14  ;;  %p1746_p0 = scmp.lt.u32.totalorder %s1739_s14, %s2452_s7 }
  0x46   : > { %p1742_p12 = pnand %p1740_p11, %p2088_p8 }
  0x48   : > { %p1743_p13 = pneg %p1742_p12 }
  0x4a   : > { %p1748_p2 = pnand %p1746_p0, %p1743_p13 }
  0x4c   : > { %1751 = shalt.err (!%p1748_p2)
}
  0x4d   : > { %s1752_s26 = scalar_lea.vmem %s2078_s29, 512  ;;  %p1760_p4 = scmp.lt.s32.totalorder %s2078_s29, %s2078_s29 }
  0x4e   : > { %p1753_p5 = scmp.ne.s32.totalorder %s2078_s29, %s1752_s26  ;;  %p1761_p10 = scmp.lt.s32.totalorder %s1752_s26, %s1752_s26 }
  0x50   : > { %p1755_p7 = pnand %p1753_p5, %p2088_p8  ;;  %p1762_p11 = por %p1761_p10, %p1760_p4 }
  0x52   : > { %p1756_p9 = pneg %p1755_p7 }
  0x54   : > { %p1763_p12 = pnand %p1762_p11, %p1756_p9 }
  0x56   : > { %1766 = shalt.err (!%p1763_p12)
}
  0x57   : > { %1603 = dma.hbm_to_vmem [thread:$0]  (!%p2072_p6), %s2452_s7, 512, %s2078_s29, [#allocation12], %s1964_s30, %s1964_s30, %s1965_s12  }
  0x58   : > { %s1966_s10 = smov [#allocation7]   ;;  %s1967_s13 = smov [#allocation10]  }
  0x59   : > { %s329_s11 = sshll.u32 %s1966_s10, 4  ;;  %s353_s14 = sshll.u32 %s1967_s13, 4  ;;  %s330_s11 = int_to_ptr.vmem [resolvable:$true] %s329_s11  ;;  %s354_s14 = int_to_ptr.vmem [resolvable:$true] %s353_s14 }
  0x5a   : > { %s1767_s25 = scalar_lea.hbm %s2449_s4, 16 }
  0x5b   : > { %p1768_p13 = scmp.ne.s32.totalorder %s2449_s4, %s1767_s25  ;;  %p1774_p5 = scmp.lt.u32.totalorder %s1767_s25, %s2449_s4 }
  0x5d   : > { %p1770_p0 = pnand %p1768_p13, %p2088_p8 }
  0x5f   : > { %p1771_p2 = pneg %p1770_p0 }
  0x61   : > { %p1776_p7 = pnand %p1774_p5, %p1771_p2 }
  0x63   : > { %1779 = shalt.err (!%p1776_p7)
}
  0x64   : > { %s1780_s29 = scalar_lea.vmem %s330_s11, 16  ;;  %s1787_s30 = scalar_lea.vmem %s330_s11, 32 }
  0x65   : > { %p1781_p9 = scmp.ne.s32.totalorder %s330_s11, %s1780_s29  ;;  %p1788_p11 = scmp.lt.s32.totalorder %s330_s11, %s330_s11 }
  0x66   : > { %p1789_p12 = scmp.lt.s32.totalorder %s1787_s30, %s1780_s29 }
  0x67   : > { %p1783_p4 = pnand %p1781_p9, %p2088_p8 }
  0x68   : > { %p1790_p1 = por %p1789_p12, %p1788_p11 }
  0x69   : > { %p1784_p10 = pneg %p1783_p4 }
  0x6b   : > { %p1791_p3 = pnand %p1790_p1, %p1784_p10 }
  0x6d   : > { %1794 = shalt.err (!%p1791_p3)
}
  0x6e   : > { %1594 = dma.hbm_to_vmem [thread:$0]  (!%p2072_p6), %s2449_s4, 16, %s330_s11, [#allocation6]  }
  0x6f   : > { %s1795_s13 = scalar_lea.hbm %s2451_s6, 16 }
  0x70   : > { %p1796_p13 = scmp.ne.s32.totalorder %s2451_s6, %s1795_s13  ;;  %p1802_p3 = scmp.lt.u32.totalorder %s1795_s13, %s2451_s6 }
  0x72   : > { %p1798_p0 = pnand %p1796_p13, %p2088_p8 }
  0x74   : > { %p1799_p1 = pneg %p1798_p0 }
  0x76   : > { %p1804_p2 = pnand %p1802_p3, %p1799_p1 }
  0x78   : > { %1807 = shalt.err (!%p1804_p2)
}
  0x79   : > { %s1808_s26 = scalar_lea.vmem %s354_s14, 16  ;;  %s1815_s11 = scalar_lea.vmem %s354_s14, 32 }
  0x7a   : > { %p1809_p5 = scmp.ne.s32.totalorder %s354_s14, %s1808_s26  ;;  %p1816_p4 = scmp.lt.s32.totalorder %s354_s14, %s354_s14 }
  0x7b   : > { %p1817_p10 = scmp.lt.s32.totalorder %s1815_s11, %s1808_s26 }
  0x7c   : > { %p1811_p7 = pnand %p1809_p5, %p2088_p8 }
  0x7d   : > { %p1818_p11 = por %p1817_p10, %p1816_p4 }
  0x7e   : > { %p1812_p9 = pneg %p1811_p7 }
  0x80   : > { %p1819_p12 = pnand %p1818_p11, %p1812_p9 }
  0x82   : > { %1822 = shalt.err (!%p1819_p12)
}
  0x83   : > { %1600 = dma.hbm_to_vmem [thread:$0]  (!%p2072_p6), %s2451_s6, 16, %s354_s14, [#allocation9]  }
  0x84   : > { %s1968_s30 = smov [#allocation13]   ;;  %s1823_s10 = scalar_lea.hbm %s2453_s8, 16 }
  0x85   : > { %s377_s12 = sshll.u32 %s1968_s30, 4  ;;  %p1824_p13 = scmp.ne.s32.totalorder %s2453_s8, %s1823_s10  ;;  %s378_s12 = int_to_ptr.vmem [resolvable:$true] %s377_s12 }
  0x86   : > { %p1830_p3 = scmp.lt.u32.totalorder %s1823_s10, %s2453_s8 }
  0x87   : > { %p1826_p0 = pnand %p1824_p13, %p2088_p8 }
  0x89   : > { %p1827_p1 = pneg %p1826_p0 }
  0x8b   : > { %p1832_p2 = pnand %p1830_p3, %p1827_p1 }
  0x8d   : > { %1835 = shalt.err (!%p1832_p2)
}
  0x8e   : > { %s1836_s14 = scalar_lea.vmem %s378_s12, 16  ;;  %s1843_s28 = scalar_lea.vmem %s378_s12, 32 }
  0x8f   : > { %p1837_p5 = scmp.ne.s32.totalorder %s378_s12, %s1836_s14  ;;  %p1844_p4 = scmp.lt.s32.totalorder %s378_s12, %s378_s12 }
  0x90   : > { %p1845_p10 = scmp.lt.s32.totalorder %s1843_s28, %s1836_s14 }
  0x91   : > { %p1839_p7 = pnand %p1837_p5, %p2088_p8 }
  0x92   : > { %p1846_p11 = por %p1845_p10, %p1844_p4 }
  0x93   : > { %p1840_p9 = pneg %p1839_p7 }
  0x95   : > { %p1847_p12 = pnand %p1846_p11, %p1840_p9 }
  0x97   : > { %1850 = shalt.err (!%p1847_p12)
}
  0x98   : > { %1606 = dma.hbm_to_vmem [thread:$0]  (!%p2072_p6), %s2453_s8, 16, %s378_s12, [#allocation12]  }
  0x99   : > { %s1399_s16 = sadd.s32 4294967294, %s1959_s20   ;;  %s2220_s27 = sadd.s32 1, %s1959_s20  }
  0x9a   : > { %s34_s22 = ssub.s32 %s1959_s20, %s2220_s27  ;;  %s37_s29 = sadd.s32 1, %s1955_s19 }
  0x9b   : > { %p35_p8 = scmp.eq.s32.totalorder %s34_s22, 0  ;;  %p44_p13 = scmp.ne.s32.totalorder %s1955_s19, %s1951_s18 }
  0x9c   : > { %p45_p0 = scmp.eq.s32.totalorder %s1959_s20, 0  ;;  %p50_p1 = scmp.ne.s32.totalorder %s1951_s18, %s1947_s17 }
  0x9d   : > { %s2231_s30 = scalar_select %p35_p8, %s1955_s19, %s37_s29  }
  0x9e   : > { %p2233_p3 = por %p45_p0, %p44_p13  ;;  %p2471_p2 = scmp.eq.s32.totalorder %s2056_s23, 0 }
  0x9f   : > { %p284_p5 = scmp.eq.s32.totalorder %s2056_s23, 1  ;;  %p290_p7 = scmp.eq.s32.totalorder %s1399_s16, 1 }
  0xa0   : > { %p2239_p6 = por %p2471_p2, %p50_p1  ;;  %p1621_p9 = scmp.lt.s32.totalorder %s1959_s20, 2 }
  0xa1   : > { %s394_s3 = sand.u32 1, %s1955_s19   ;;  %p2246_p4 = por %p284_p5, %p44_p13 }
  0xa2   : > { %p2250_p10 = por %p290_p7, %p50_p1  ;;  %s1408_s15 = sshll.u32 %s394_s3, 3 }
  0xa3   : > { %s2473_s10 = scalar_select %p2246_p4, 1, 0 }
  0xa4   : > { %s2474_s13 = scalar_select %p2250_p10, 1, 0 }
  0xa5   : > { %s1409_s21 = sshll.u32 %s1959_s20, 7  ;;  %s398_s26 = scalar_lea.vmem [#allocation2], %s1408_s15 }
  0xa6   : > { %s2258_s28 = scalar_lea.hbm %s2445_s0, %s1409_s21  ;;  %s405_s11 = sshll.u32 %s398_s26, 4  ;;  %s2260_s11 = int_to_ptr.vmem [resolvable:$true] %s405_s11 }
  0xa7   : > { %p2264_p11 = pnand %p1621_p9, %p2233_p3  ;;  %s395_s22 = scalar_lea.sflag [#allocation3], %s394_s3 }
  0xa8   : > { %s1851_s29 = scalar_lea.hbm %s2258_s28, 128  ;;  %s1856_s25 = scalar_lea.hbm %s2445_s0, 256 }
  0xa9   : > { %p1852_p12 = scmp.ne.s32.totalorder %s2258_s28, %s1851_s29  ;;  %p1853_p8 = pneg %p2264_p11 }
  0xaa   : > { %p1857_p1 = scmp.lt.u32.totalorder %s2258_s28, %s2445_s0  ;;  %p1858_p3 = scmp.lt.u32.totalorder %s1856_s25, %s1851_s29 }
  0xab   : > { %p1854_p13 = pnand %p1853_p8, %p1852_p12  ;;  %p1860_p5 = scmp.lt.u32.totalorder %s1851_s29, %s2258_s28 }
  0xac   : > { %p1859_p2 = por %p1858_p3, %p1857_p1 }
  0xad   : > { %p1855_p0 = pneg %p1854_p13 }
  0xae   : > { %p1861_p7 = por %p1860_p5, %p1859_p2 }
  0xb0   : > { %p1862_p9 = pnand %p1861_p7, %p1855_p0 }
  0xb2   : > { %1865 = shalt.err (!%p1862_p9)
}
  0xb3   : > { %s1866_s3 = scalar_lea.vmem %s2260_s11, 128  ;;  %s1969_s26 = smov [#allocation2]  }
  0xb4   : > { %p1867_p12 = scmp.ne.s32.totalorder %s2260_s11, %s1866_s3  ;;  %s1871_s15 = sshll.u32 %s1969_s26, 4  ;;  %s1872_s15 = int_to_ptr.vmem [resolvable:$false] %s1871_s15 }
  0xb5   : > { %s1873_s21 = scalar_lea.vmem %s1872_s15, 256  ;;  %p1874_p4 = scmp.lt.s32.totalorder %s2260_s11, %s1872_s15 }
  0xb6   : > { %p1869_p13 = pnand %p1867_p12, %p1853_p8  ;;  %p1875_p1 = scmp.lt.s32.totalorder %s1873_s21, %s1866_s3 }
  0xb8   : > { %p1870_p10 = pneg %p1869_p13  ;;  %p1876_p3 = por %p1875_p1, %p1874_p4 }
  0xba   : > { %p1877_p2 = pnand %p1876_p3, %p1870_p10 }
  0xbc   : > { %1880 = shalt.err (!%p1877_p2)
}
  0xbd   : > { %1610 = dma.hbm_to_vmem [thread:$0]  (!%p2264_p11), %s2258_s28, 128, %s2260_s11, %s395_s22  }
  0xbe   : > { %p2476_p0 = scmp.ne.s32.totalorder %s2466_s24, 0 }
  0xbf   : > { %s2296_s29 = sand.u32 (!%p2476_p0), 1, %s1951_s18  }
  0xc0   : > { %414 = sbr.rel (%p2476_p0) target bundleno = 1829 (0x725), region = 64  ;;  %s1411_s25 = sshll.u32 (!%p2476_p0), %s2296_s29, 3 }
  0xc1   : > { %s417_s9 = scalar_lea.sflag (!%p2476_p0), [#allocation3], %s2296_s29  ;;  %s420_s14 = scalar_lea.vmem (!%p2476_p0), [#allocation2], %s1411_s25 }
  0xc7   : > { %1926 = dma.done.wait (%p2239_p6), %s417_s9, 128  }
  0xc8   : > { %1928 = vsyncadd (%p2239_p6), %s417_s9, 4294967168  ;;  %p2477_p4 = scmp.eq.s32.totalorder %s2056_s23, 0 }
  0xca   : > { %1930 = dma.done.wait (%p2477_p4), [#allocation6], 528   ;;  %p2478_p10 = pmov %p2477_p4 }
  0xcb   : > { %p2479_p11 = pmov %p2477_p4 }
  0xcc   : > { %1932 = vsyncadd (%p2478_p10), [#allocation6], 4294966768 }
  0xcd   : > { %1934 = dma.done.wait (%p2479_p11), [#allocation9], 528   ;;  %p2480_p8 = pmov %p2477_p4 }
  0xce   : > { %p2481_p5 = pmov %p2477_p4 }
  0xcf   : > { %1936 = vsyncadd (%p2480_p8), [#allocation9], 4294966768 }
  0xd0   : > { %1938 = dma.done.wait (%p2481_p5), [#allocation12], 528   ;;  %p2482_p7 = pmov %p2477_p4 }
  0xd1   : > { %vm484_vm0 = vcmask 261120   ;;  %v2318_v0 = vld [vmem:[%s420_s14] sm:$0xff]  ;;  %v515_v7 = vld [vmem:[#allocation5] sm:$0xff]  ;;  %v516_v8 = vld [vmem:[#allocation5 + $0x8] sm:$0xff]  ;;  %v1970_v10 = vmov 0.0|0.0   ;;  %vm1971_vm1 = vmmov 0   ;;  %v761_v50 = vlaneseq }
  0xd2   : > { %1940 = vsyncadd (%p2482_p7), [#allocation12], 4294966768  ;;  %v485_v1 = vsel %vm484_vm0, %v2318_v0, 0.0  ;;  %v599_v9 = vld [vmem:[#allocation8] sm:$0xff]  ;;  %1536 = vmatprep.subr.bf16.mxu0 %v1970_v10  ;;  %v1537_v11 = vpack.c.bf16 %v516_v8, %v515_v7  ;;  %1542 = vmatprep.subr.bf16.mxu1 %v1970_v10  ;;  %v600_v12 = vld [vmem:[#allocation8 + $0x8] sm:$0xff]  ;;  %v1972_v18 = vmov 0.0  }
  0xd3   : > { %486 = vadd.xlane.f32.xlu0 %v485_v1  ;;  %v517_v13 = vld [vmem:[#allocation5 + $0x10] sm:$0xff]  ;;  %v518_v14 = vld [vmem:[#allocation5 + $0x18] sm:$0xff]  ;;  %v1543_v15 = vpack.c.bf16 %v600_v12, %v599_v9  ;;  %1477 = vmatprep.mubr.msk.f32.mxu0 %vm1971_vm1, %v1972_v18  ;;  %v680_v27 = vld [vmem:[#allocation11] sm:$0xff]  ;;  %vm766_vm2 = vcmask 130048   ;;  %s1973_s16 = smov 112   ;;  %v762_v51 = vshrl.u32 %v761_v50, 7 }
  0xd4   : > { %v601_v16 = vld [vmem:[#allocation8 + $0x10] sm:$0xff]  ;;  %v602_v17 = vld [vmem:[#allocation8 + $0x18] sm:$0xff]  ;;  %1488 = vmatprep.mubr.msk.f32.mxu1 %vm1971_vm1, %v1972_v18  ;;  %1538 = vmatpush3.bf16.msra.mxu0 %v1537_v11  ;;  %v1540_v19 = vpack.c.bf16 %v518_v14, %v517_v13  ;;  %v1419_v25 = vld [vmem:[%s2446_s1] ss:$0 sm:$0xff]  ;;  %v764_v52 = vand.u32 127, %v761_v50  ;;  %vm845_vm4 = vcmask 64512  }
  0xd5   : > { %1544 = vmatpush3.bf16.msra.mxu1 %v1543_v15  ;;  %1539 = vmatprep.subr.bf16.mxu0 %v1970_v10  ;;  %v1546_v20 = vpack.c.bf16 %v602_v17, %v601_v16  ;;  %v681_v28 = vld [vmem:[#allocation11 + $0x8] sm:$0xff]  ;;  %v682_v33 = vld [vmem:[#allocation11 + $0x10] sm:$0xff]  ;;  %v683_v34 = vld [vmem:[#allocation11 + $0x18] sm:$0xff]  ;;  %s2483_s26 = sld [smem:[#allocation21_spill]]  ;;  %s1437_s22 = sshll.u32 %s2056_s23, 7 }
  0xd6   : > { %1545 = vmatprep.subr.bf16.mxu1 %v1970_v10  ;;  %v1420_v29 = vld [vmem:[%s2447_s2] ss:$0 sm:$0xff]  ;;  %v1549_v31 = vpack.c.bf16 %v681_v28, %v680_v27  ;;  %v1552_v35 = vpack.c.bf16 %v683_v34, %v682_v33  ;;  %v1423_v36 = vld [vmem:[#allocation10] ss:$0 sm:$0xff]  ;;  %v1421_v39 = vld [vmem:[#allocation7] ss:$0 sm:$0xff]  ;;  %vm765_vm3 = vcmp.ge.s32.totalorder %v762_v51, %v764_v52 }
  0xd7   : > { %v1425_v44 = vld [vmem:[#allocation13] ss:$0 sm:$0xff]  ;;  %s482_s3 = scalar_lea.vmem [#allocation14], %s1411_s25  ;;  %s2485_s14 = sld [smem:[#allocation23_spill]] }
  0xd8   : > { %1541 = vmatpush3.bf16.msra.mxu0 %v1540_v19  ;;  %s1272_s15 = sshll.u32 %s482_s3, 4  ;;  %s1259_s12 = scalar_lea.sflag [#allocation4], %s2296_s29  ;;  %s2402_s15 = int_to_ptr.vmem [resolvable:$true] %s1272_s15 }
  0xd9   : > { %1547 = vmatpush3.bf16.msra.mxu1 %v1546_v20  ;;  %1548 = vmatprep.subr.bf16.mxu0 %v1970_v10  ;;  %s1881_s23 = scalar_lea.vmem %s2402_s15, 128  ;;  %p2486_p9 = scmp.ne.s32.totalorder %s2473_s10, 0 }
  0xda   : > { %1502 = vmatprep.subr.mxu1 %v1972_v18  ;;  %p1882_p6 = scmp.ne.s32.totalorder %s2402_s15, %s1881_s23  ;;  %s1974_s25 = smov [#allocation14]  }
  0xdb   : > { %v1100_v14 = vld [vmem:[%s2483_s26 + $0x10] sm:$0xff]  ;;  %v1101_v15 = vld [vmem:[%s2483_s26 + $0x18] sm:$0xff]  ;;  %v930_v20 = vld [vmem:[%s2483_s26] sm:$0xff]  ;;  %s1885_s28 = sshll.u32 %s1974_s25, 4  ;;  %s1886_s28 = int_to_ptr.vmem [resolvable:$false] %s1885_s28 }
  0xdc   : > { %v1555_v16 = vpack.c.bf16 %v1101_v15, %v1100_v14  ;;  %p1883_p12 = pnand %p1882_p6, %p2486_p9  ;;  %s1887_s11 = scalar_lea.vmem %s1886_s28, 256 }
  0xdd   : > { %s2400_s24 = scalar_lea.hbm %s2485_s14, %s1437_s22  ;;  %p1888_p1 = scmp.lt.s32.totalorder %s2402_s15, %s1886_s28 }
  0xde   : > { %p1884_p13 = pneg %p1883_p12  ;;  %p1889_p3 = scmp.lt.s32.totalorder %s1887_s11, %s1881_s23 }
  0xe0   : > { %p1890_p2 = por %p1889_p3, %p1888_p1 }
  0xe2   : > { %p1891_p0 = pnand %p1890_p2, %p1884_p13 }
 0x160   : > { %v487_v2 = vpop.xlane.xlu0 %486 }
 0x161   : > { %v489_v3 = vmul.f32 0.03125, %v487_v2 }
 0x163   : > { %v490_v4 = vsub.f32 %v2318_v0, %v489_v3 }
 0x165   : > { %v491_v5 = vmul.f32 %v490_v4, %v490_v4 }
 0x167   : > { %v492_v6 = vsel %vm484_vm0, %v491_v5, 0.0 }
 0x168   : > { %493 = vadd.xlane.f32.xlu0 %v492_v6 }
 0x1f5   : > { %v494_v21 = vpop.xlane.xlu0 %493 }
 0x1f6   : > { %v495_v22 = vmul.f32 0.03125, %v494_v21  ;;  %v931_v21 = vld [vmem:[%s2483_s26 + $0x8] sm:$0xff] }
 0x1f8   : > { %v496_v23 = vadd.f32 1e-05, %v495_v22 }
 0x1fa   : > { %1673 = vrsqrt.f32 %v496_v23  ;;  %v1558_v23 = vpack.c.bf16 %v931_v21, %v930_v20 }
 0x204   : > { %v1674_v24 = vpop.eup %1673 }
 0x205   : > { %v498_v26 = vmul.f32 %v1674_v24, %v490_v4 }
 0x207   : > { %v506_v30 = vmul.f32 %v1419_v25, %v498_v26 }
 0x209   : > { %v514_v32 = vadd.f32 %v1420_v29, %v506_v30 }
 0x20b   : > { %1478 = vmatmul.mubr.msk.f32.vlgmr.msra.gmra.mrb[0].mxu0 %vm484_vm0, %v514_v32  ;;  %1489 = vmatmul.mubr.msk.f32.vlgmr.msra.gmra.mrb[0].mxu1 %vm484_vm0, %v514_v32 }
 0x20c   : > { %1550 = vmatpush3.bf16.msra.mxu0 %v1549_v31  ;;  %1499 = vmatprep.mubr.msk.f32.mxu0 %vm1971_vm1, %v1972_v18 }
 0x20d   : > { %1551 = vmatprep.subr.bf16.mxu0 %v1970_v10  ;;  %1504 = vmatprep.mubr.msk.f32.mxu1 %vm1971_vm1, %v1972_v18 }
 0x210   : > { %1553 = vmatpush3.bf16.msra.mxu0 %v1552_v35 }
 0x211   : > { %1512 = vmatprep.subr.mxu0 %v1972_v18 }
 0x213   : > { %1500 = vmatmul.mubr.msk.f32.vlgmr.msra.gmra.mrb[2].mxu0 %vm484_vm0, %v514_v32 }
 0x214   : > { %1514 = vmatprep.mubr.msk.f32.mxu0 %vm1971_vm1, %v1972_v18 }
 0x2de   : > { %v595_v37 = vpop.f32.mrb[0].mxu0  ;;  %v676_v38 = vpop.f32.mrb[0].mxu1 }
 0x2df   : > { %v677_v40 = vadd.f32 %v1423_v36, %v676_v38  ;;  %v1479_v41 = vpop.f32.mrb[1].mxu0  ;;  %v1490_v42 = vpop.f32.mrb[1].mxu1  ;;  %v596_v43 = vadd.f32 %v1421_v39, %v595_v37 }
 0x2e1   : > { %934 = vrot.lane.b32.xlu1 %v677_v40, %s1973_s16  ;;  %1503 = vmatpush3.xpose.msk.msra.mxu1 %vm766_vm2, %v677_v40 }
 0x2e2   : > { %1507 = vmatprep.subr.mxu1 %v1972_v18 }
 0x2e4   : > { %1505 = vmatmul.mubr.msk.f32.vlgmr.msra.gmra.mrb[2].mxu1 %vm766_vm2, %v596_v43 }
 0x2e5   : > { %932 = vrot.lane.b32.xlu1 %v596_v43, %s1973_s16  ;;  %1509 = vmatprep.mubr.msk.f32.mxu1 %vm1971_vm1, %v1972_v18 }
 0x2e6   : > { %v757_v45 = vpop.f32.mrb[2].mxu0 }
 0x2e7   : > { %v758_v46 = vadd.f32 %v1425_v44, %v757_v45  ;;  %v1501_v47 = vpop.f32.mrb[3].mxu0 }
 0x2e9   : > { %1508 = vmatpush3.msra.mxu1 %v758_v46 }
 0x2ea   : > { %1517 = vmatprep.subr.mxu1 %v1972_v18 }
 0x353   : > { %v935_v48 = vpop.permute.xlu1 %934 }
 0x354   : > { %1513 = vmatpush3.xpose.msk.msra.mxu0 %vm766_vm2, %v935_v48 }
 0x355   : > { %1554 = vmatprep.subr.bf16.mxu0 %v1970_v10 }
 0x357   : > { %v933_v49 = vpop.permute.xlu1 %932 }
 0x358   : > { %1515 = vmatmul.mubr.msk.f32.vlgmr.msra.gmra.mrb[4].mxu0 %vm766_vm2, %v933_v49 }
 0x359   : > { %1526 = vmatprep.mubr.msk.f32.mxu0 %vm1971_vm1, %v1972_v18  ;;  %1556 = vmatpush3.bf16.msra.mxu0 %v1555_v16 }
 0x3b7   : > { %v839_v53 = vpop.f32.mrb[2].mxu1 }
 0x3b8   : > { %v843_v54 = vmul.f32 0.25, %v839_v53  ;;  %v1506_v55 = vpop.f32.mrb[3].mxu1 }
 0x3ba   : > { %v844_v56 = vsel %vm765_vm3, %v843_v54, -inf }
 0x3bb   : > { %v846_v57 = vsel %vm845_vm4, %v844_v56, -inf }
 0x3bc   : > { %847 = vmax.xlane.f32.xlu0 %v846_v57 }
 0x42b   : > { %v1006_v58 = vpop.f32.mrb[4].mxu0 }
 0x42c   : > { %v1010_v59 = vmul.f32 0.25, %v1006_v58  ;;  %v1516_v60 = vpop.f32.mrb[5].mxu0 }
 0x42e   : > { %v1011_v61 = vsel %vm765_vm3, %v1010_v59, -inf }
 0x42f   : > { %v1012_v62 = vsel %vm845_vm4, %v1011_v61, -inf }
 0x430   : > { %1013 = vmax.xlane.f32.xlu1 %v1012_v62 }
 0x449   : > { %v848_v63 = vpop.xlane.xlu0 %847 }
 0x44a   : > { %v849_v1 = vsub.f32 %v844_v56, %v848_v63 }
 0x44c   : > { %v850_v2 = vmul.f32 1.442695, %v849_v1 }
 0x44e   : > { %1675 = vpow2.f32 %v850_v2 }
 0x458   : > { %v1676_v3 = vpop.eup %1675 }
 0x459   : > { %v852_v4 = vsel %vm845_vm4, %v1676_v3, 0.0 }
 0x45a   : > { %853 = vadd.xlane.f32.xlu0 %v852_v4 }
 0x4bd   : > { %v1014_v5 = vpop.xlane.xlu1 %1013 }
 0x4be   : > { %v1015_v6 = vsub.f32 %v1011_v61, %v1014_v5 }
 0x4c0   : > { %v1016_v7 = vmul.f32 1.442695, %v1015_v6 }
 0x4c2   : > { %1677 = vpow2.f32 %v1016_v7 }
 0x4cc   : > { %v1678_v8 = vpop.eup %1677 }
 0x4cd   : > { %v1018_v9 = vsel %vm845_vm4, %v1678_v8, 0.0 }
 0x4ce   : > { %1019 = vadd.xlane.f32.xlu0 %v1018_v9 }
 0x4e4   : > { %1024 = vrot.lane.b32.xlu0 %v758_v46, %s1973_s16  ;;  %s2484_s16 = sld [smem:[#allocation22_spill]] }
 0x4e7   : > { %v854_v11 = vpop.xlane.xlu0 %853 }
 0x4e8   : > { %1679 = vrcp.f32 %v854_v11 }
 0x4ea   : > { %v1435_v33 = vld [vmem:[%s2484_s16] ss:$0 sm:$0xff] }
 0x4f2   : > { %v1680_v12 = vpop.eup %1679 }
 0x4f3   : > { %v856_v13 = vmul.f32 %v1680_v12, %v1676_v3 }
 0x4f5   : > { %1510 = vmatmul.mubr.msk.f32.vlgmr.msra.gmra.mrb[4].mxu1 %vm845_vm4, %v856_v13 }
 0x4f6   : > { %1519 = vmatprep.mubr.msk.f32.mxu1 %vm1971_vm1, %v1972_v18 }
 0x55b   : > { %v1020_v17 = vpop.xlane.xlu0 %1019 }
 0x55c   : > { %1681 = vrcp.f32 %v1020_v17 }
 0x55f   : > { %v1025_v19 = vpop.permute.xlu0 %1024 }
 0x560   : > { %1518 = vmatpush3.msra.mxu1 %v1025_v19 }
 0x561   : > { %1557 = vmatprep.subr.bf16.mxu1 %v1970_v10 }
 0x566   : > { %v1682_v22 = vpop.eup %1681 }
 0x567   : > { %v1022_v24 = vmul.f32 %v1682_v22, %v1678_v8 }
 0x569   : > { %1520 = vmatmul.mubr.msk.f32.vlgmr.msra.gmra.mrb[6].mxu1 %vm845_vm4, %v1022_v24 }
 0x56a   : > { %1559 = vmatpush3.bf16.msra.mxu1 %v1558_v23  ;;  %1533 = vmatprep.mubr.msk.f32.mxu1 %vm1971_vm1, %v1972_v18 }
 0x5c8   : > { %v926_v10 = vpop.f32.mrb[4].mxu1 }
 0x5c9   : > { %v1511_v25 = vpop.f32.mrb[5].mxu1  ;;  %1534 = vmatmul.mubr.msk.f32.vlgmr.msra.gmra.mrb[8].mxu1 %vm766_vm2, %v926_v10 }
 0x63c   : > { %v1096_v26 = vpop.f32.mrb[6].mxu1 }
 0x63d   : > { %v1521_v27 = vpop.f32.mrb[7].mxu1  ;;  %1527 = vmatmul.mubr.msk.f32.vlgmr.msra.gmra.mrb[6].mxu0 %vm766_vm2, %v1096_v26 }
 0x69c   : > { %v1244_v28 = vpop.f32.mrb[8].mxu1 }
 0x69d   : > { %v1535_v29 = vpop.f32.mrb[9].mxu1 }
 0x710   : > { %v1171_v30 = vpop.f32.mrb[6].mxu0 }
 0x711   : > { %v1245_v31 = vadd.f32 %v1244_v28, %v1171_v30  ;;  %v1528_v32 = vpop.f32.mrb[7].mxu0 }
 0x713   : > { %v1248_v18 = vadd.f32 %v1245_v31, %v2318_v0 }
 0x715   : > { %v1256_v34 = vadd.f32 %v1435_v33, %v1248_v18 }
 0x717   : > { %1257 = vst.msk [vmem:[%s482_s3] sm:$0xff] %vm484_vm0, %v1256_v34 }
 0x718   : > { %1894 = shalt.err (!%p1891_p0)
}
 0x719   : > { %s1895_s29 = scalar_lea.hbm %s2400_s24, 128  ;;  %s1899_s3 = scalar_lea.hbm %s2485_s14, 256 }
 0x71a   : > { %p1896_p4 = scmp.ne.s32.totalorder %s2400_s24, %s1895_s29  ;;  %p1900_p8 = scmp.lt.u32.totalorder %s2400_s24, %s2485_s14 }
 0x71b   : > { %p1901_p5 = scmp.lt.u32.totalorder %s1899_s3, %s1895_s29  ;;  %p1903_p6 = scmp.lt.u32.totalorder %s1895_s29, %s2400_s24 }
 0x71c   : > { %p1897_p10 = pnand %p1896_p4, %p2486_p9 }
 0x71d   : > { %p1902_p7 = por %p1901_p5, %p1900_p8 }
 0x71e   : > { %p1898_p11 = pneg %p1897_p10 }
 0x71f   : > { %p1904_p12 = por %p1903_p6, %p1902_p7 }
 0x721   : > { %p1905_p13 = pnand %p1904_p12, %p1898_p11 }
 0x723   : > { %1908 = shalt.err (!%p1905_p13)
}
 0x724   : > { %1586 = dma.vmem_to_hbm [thread:$0]  (%p2486_p9), %s2402_s15, 128, %s2400_s24, %s1259_s12  }
 0x725 PF: > { %s1284_s23 = sand.u32 1, %s1947_s17   ;;  %p2487_p1 = scmp.ne.s32.totalorder %s2474_s13, 0 }
 0x726   : > { %p2488_p3 = scmp.ge.s32.totalorder %s1959_s20, 2  ;;  %s1285_s25 = scalar_lea.sflag [#allocation4], %s1284_s23 }
 0x728   : > { %p1612_p2 = pnand %p2488_p3, %p2487_p1 }
 0x72a   : > { %1942 = dma.done.wait (!%p1612_p2), %s1285_s25, 128  }
 0x72b   : > { %1944 = vsyncadd (!%p1612_p2), %s1285_s25, 4294967168  ;;  %p27_p0 = scmp.ge.s32.totalorder %s2220_s27, 4   ;;  %s2489_s17 = smov %s1951_s18 }
 0x72c   : > { %s2490_s18 = smov %s1955_s19  ;;  %s2491_s19 = smov %s2231_s30 }
 0x72d   : > { %s2492_s20 = smov %s2220_s27  ;;  %29 = sbr.rel (!%p27_p0) target bundleno = 13 (0xd), region = 133 }
 0x734   :  { %1290 = vsyncpa [#allocation3], 1 }
 0x735   :  { %1292 = vsyncpa [#allocation3 + $0x1], 1 }
 0x736   :  { %1293 = vsyncpa [#allocation6], 1 }
 0x737   :  { %1294 = vsyncpa [#allocation9], 1 }
 0x738   :  { %1295 = vsyncpa [#allocation12], 1 }
 0x739   :  { %1296 = vsyncpa [#allocation4], 1 }
 0x73a   :  { %1298 = vsyncpa [#allocation4 + $0x1], 1 }

</bundles_post_ra>
